<compile_context>
chip_gen: v5e
topology: v5e:2x2
jax: 0.10.0
libtpu: 0.0.40
codegen_flags: <defaults>
</compile_context>

<pallas_src>
import functools

import jax
import jax.numpy as jnp
from jax.experimental import pallas as pl
from jax.experimental.pallas import tpu as pltpu

_LANE = 128
_SUBLANE = 8
_NEG_BIG = -1e30  # finite "-inf": fully-masked rows stay finite (see docstring)


# ----------------------------- small helpers --------------------------------

def _round_up(x, m):
    return ((x + m - 1) // m) * m


def _aligned_divisors(n, align):
    """Divisors of n that are multiples of `align`, descending (n always included)."""
    ds = {d for d in range(align, n + 1, align) if n % d == 0}
    ds.add(n)
    return sorted(ds, reverse=True)


def _vmem_capacity_bytes():
    try:
        info = pltpu.get_tpu_info()
        cap = getattr(info, "vmem_capacity_bytes", None)
        if cap:
            return int(cap)
    except Exception:
        pass
    return 64 * 1024 * 1024  # v7x per-TensorCore physical VMEM: safe lower bound


# ----------------------------- stage 1: projection --------------------------

def _proj_kernel(x_ref, wq_ref, wk_ref, wv_ref, bq_ref, bk_ref, bv_ref,
                 q_ref, k_ref, v_ref, *, scale):
    x = x_ref[...]
    q = jnp.dot(x, wq_ref[...], preferred_element_type=jnp.float32) + bq_ref[...]
    q_ref[...] = (q * scale).astype(q_ref.dtype)       # fold 1/sqrt(H) into Q
    k = jnp.dot(x, wk_ref[...], preferred_element_type=jnp.float32) + bk_ref[...]
    k_ref[...] = k.astype(k_ref.dtype)
    v = jnp.dot(x, wv_ref[...], preferred_element_type=jnp.float32) + bv_ref[...]
    v_ref[...] = v.astype(v_ref.dtype)


def _choose_proj_tile(M, E, H, isz, budget):
    Ep = _round_up(E, _LANE)
    Hp = _round_up(H, _LANE)
    w_resident = 3 * _round_up(E, _SUBLANE) * Hp * isz

    def need(tm):
        x_t = 2 * tm * Ep * isz              # double-buffered x tile
        out_t = 3 * 2 * tm * Hp * isz        # q/k/v output tiles (lane padded)
        f32_t = 3 * tm * Hp * 4              # f32 matmul results before cast
        return x_t + out_t + f32_t + w_resident

    cands = [d for d in _aligned_divisors(M, _SUBLANE) if d <= 2048]
    if not cands:
        cands = [_aligned_divisors(M, _SUBLANE)[-1]]
    fitting = [d for d in cands if need(d) <= budget]
    if not fitting:
        return cands[-1]
    multi = [d for d in fitting if M // d >= 2]   # keep both v7x cores busy
    return multi[0] if multi else fitting[0]


def _project_qkv(x2d, wq, wk, wv, bq, bk, bv, scale, out_dtype,
                 vmem_limit, tile_budget):
    M, E = x2d.shape
    H = wq.shape[1]
    tm = _choose_proj_tile(M, E, H, x2d.dtype.itemsize, tile_budget)
    grid = (M // tm,)

    row = lambda i: (i, 0)
    full = lambda i: (0, 0)

    return pl.pallas_call(
        functools.partial(_proj_kernel, scale=scale),
        out_shape=[jax.ShapeDtypeStruct((M, H), out_dtype)] * 3,
        grid_spec=pltpu.PrefetchScalarGridSpec(
            num_scalar_prefetch=0,
            grid=grid,
            in_specs=[
                pl.BlockSpec((tm, E), row),      # x rows
                pl.BlockSpec((E, H), full),      # wq (VMEM resident)
                pl.BlockSpec((E, H), full),      # wk
                pl.BlockSpec((E, H), full),      # wv
                pl.BlockSpec((1, H), full),      # bq
                pl.BlockSpec((1, H), full),      # bk
                pl.BlockSpec((1, H), full),      # bv
            ],
            out_specs=[pl.BlockSpec((tm, H), row)] * 3,
        ),
        compiler_params=pltpu.CompilerParams(
            dimension_semantics=("parallel",),
            vmem_limit_bytes=vmem_limit),
    )(x2d, wq, wk, wv, bq.reshape(1, H), bk.reshape(1, H), bv.reshape(1, H))


# ----------------------------- stage 2: flash attention ----------------------

def _make_attn_kernel(has_mask: bool):
    def kernel(q_ref, k_ref, v_ref, *rest):
        if has_mask:
            mask_ref, o_ref, m_sc, l_sc, acc_sc = rest
        else:
            o_ref, m_sc, l_sc, acc_sc = rest

        kv_idx = pl.program_id(2)

        @pl.when(kv_idx == 0)
        def _init():
            m_sc[...] = jnp.full_like(m_sc, _NEG_BIG)   # finite floor, never NaN
            l_sc[...] = jnp.zeros_like(l_sc)
            acc_sc[...] = jnp.zeros_like(acc_sc)

        q = q_ref[...]          # (bb, bq, H), already scaled by 1/sqrt(H)
        k = k_ref[...]          # (bb, bk, H)
        v = v_ref[...]          # (bb, bk, H)

        # Contract the shared H axis -> (bb, bq, bk); no explicit K transpose.
        s = jnp.einsum('bqh,bkh->bqk', q, k, preferred_element_type=jnp.float32)
        if has_mask:
            # mask tile keeps its natural broadcast shape; size-1 dims broadcast here
            s = jnp.where(mask_ref[...] == 0, _NEG_BIG, s)

        # Online softmax (stats in f32).
        m_prev = m_sc[...]
        m_new = jnp.maximum(m_prev, jnp.max(s, axis=-1, keepdims=True))
        alpha = jnp.exp(m_prev - m_new)
        p = jnp.exp(s - m_new)
        l_sc[...] = alpha * l_sc[...] + jnp.sum(p, axis=-1, keepdims=True)
        acc_sc[...] = alpha * acc_sc[...] + jnp.einsum(
            'bqk,bkh->bqh', p.astype(v.dtype), v,
            preferred_element_type=jnp.float32)
        m_sc[...] = m_new

        @pl.when(kv_idx == pl.num_programs(2) - 1)
        def _finalize():
            l = l_sc[...]
            inv = pl.reciprocal(l, approx=True)   # EUP slot
            inv = inv * (2.0 - l * inv)           # one Newton step -> ~f32 accuracy
            o_ref[...] = (acc_sc[...] * inv).astype(o_ref.dtype)

    return kernel


def _attn_vmem_bytes(bb, bq, bk, H, in_isz, out_isz,
                     has_mask, mask_b_is1, mask_q_is1):
    """VMEM footprint estimate accounting for 128-lane padding of H-wide buffers."""
    Hp = _round_up(H, _LANE)
    bqp = _round_up(bq, _SUBLANE)
    bkp_s = _round_up(bk, _SUBLANE)
    bkp_l = _round_up(bk, _LANE)
    q_t = 2 * bb * bqp * Hp * in_isz                 # double-buffered Q tile
    kv_t = 2 * 2 * bb * bkp_s * Hp * in_isz          # K + V tiles
    o_t = 2 * bb * bqp * Hp * out_isz                # output tile
    m_t = 0
    if has_mask:
        mb = 1 if mask_b_is1 else bb
        mq = 1 if mask_q_is1 else _round_up(bq, 32)  # int8 sublane tile is 32
        m_t = 2 * mb * mq * bkp_l * 1
    stats = 2 * bb * bqp * _LANE * 4                 # m, l padded to 128 lanes
    acc = bb * bqp * Hp * 4
    temps = 3 * bb * bqp * bkp_l * 4                 # s / p f32 temporaries
    return q_t + kv_t + o_t + m_t + stats + acc + temps


def _choose_attn_tiles(B, S, H, in_isz, out_isz, has_mask,
                       mask_b_is1, mask_q_is1, budget):
    q_align = 32 if has_mask else 8          # int8 mask rows want 32-row alignment
    bq_cands = [d for d in _aligned_divisors(S, q_align) if d <= 512]
    if not bq_cands:
        bq_cands = [_aligned_divisors(S, q_align)[-1]]
    bk_cands = [d for d in _aligned_divisors(S, 128) if d <= 512]  # 128-aligned always
    if not bk_cands:
        bk_cands = [_aligned_divisors(S, 128)[-1]]
    bb_cands = [d for d in _aligned_divisors(B, 1) if d <= 8]

    def pick_bb(bq):
        # shrink block_b first so (B/bb)*(S/bq) >= 2 and both v7x cores get work
        for bb in bb_cands:
            if (B // bb) * (S // bq) >= 2:
                return bb
        return bb_cands[-1]

    best = None
    for bq in bq_cands:
        bb = pick_bb(bq)
        for bk in bk_cands:
            need = _attn_vmem_bytes(bb, bq, bk, H, in_isz, out_isz,
                                    has_mask, mask_b_is1, mask_q_is1)
            if need <= budget:
                return bb, bq, bk
            if best is None or need < best[0]:
                best = (need, bb, bq, bk)
    return best[1], best[2], best[3]


# ----------------------------- public wrapper --------------------------------

def attention_head(x, wq, wk, wv, bq, bk, bv, mask=None, *,
                   block_b=None, block_q=None, block_k=None, mxu_dtype=None):
    """softmax((x@wq+bq) @ (x@wk+bk)^T / sqrt(H), mask) @ (x@wv+bv).

    x: [B,S,E]; wq/wk/wv: [E,H] (transpose of torch nn.Linear weight); b*: [H];
    mask: optional, any shape broadcastable to [B,S,S]; positions where mask == 0
    are masked.  NOTE: rows whose keys are ALL masked return a uniform average of
    V (finite) instead of torch's NaN.  mxu_dtype optionally downcasts the
    projected Q/K/V MXU feeds (e.g. jnp.bfloat16); stats/accumulation stay f32.
    """
    B, S, E = x.shape
    H = wq.shape[1]
    has_mask = mask is not None

    cap = _vmem_capacity_bytes()
    vmem_limit = (cap * 3) // 4            # ~96 MiB on v5e/v6e, ~48 MiB on v7x
    tile_budget = (vmem_limit * 7) // 10   # leave pipeline/compiler headroom

    proj_dtype = jnp.dtype(mxu_dtype) if mxu_dtype is not None else x.dtype

    # ---- Stage 1: project Q (pre-scaled), K, V exactly once -----------------
    scale = 1.0 / (float(H) ** 0.5)
    q2, k2, v2 = _project_qkv(x.reshape(B * S, E), wq, wk, wv, bq, bk, bv,
                              scale, proj_dtype, vmem_limit, tile_budget)
    qp = q2.reshape(B, S, H)
    kp = k2.reshape(B, S, H)
    vp = v2.reshape(B, S, H)

    # ---- Mask in its natural broadcastable shape (no [B,S,S] materialization)
    mask_b_is1 = mask_q_is1 = mask_k_is1 = True
    if has_mask:
        mask = jnp.asarray(mask)
        mask = (mask != 0).astype(jnp.int8)        # 1 byte/elem; ==0 => masked
        while mask.ndim < 3:
            mask = mask[None]
        mB, mQ, mK = mask.shape
        assert mB in (1, B) and mQ in (1, S) and mK in (1, S), \
            f"mask shape {mask.shape} not broadcastable to {(B, S, S)}"
        mask_b_is1, mask_q_is1, mask_k_is1 = mB == 1, mQ == 1, mK == 1

    # ---- Tile sizes: VMEM-budget & megacore aware, per-generation ------------
    if block_b is None or block_q is None or block_k is None:
        abb, abq, abk = _choose_attn_tiles(
            B, S, H, jnp.dtype(proj_dtype).itemsize, x.dtype.itemsize,
            has_mask, mask_b_is1, mask_q_is1, tile_budget)
        block_b = block_b or abb
        block_q = block_q or abq
        block_k = block_k or abk

    grid = (B // block_b, S // block_q, S // block_k)

    in_specs = [
        pl.BlockSpec((block_b, block_q, H), lambda b, qi, ki: (b, qi, 0)),   # Q
        pl.BlockSpec((block_b, block_k, H), lambda b, qi, ki: (b, ki, 0)),   # K
        pl.BlockSpec((block_b, block_k, H), lambda b, qi, ki: (b, ki, 0)),   # V
    ]
    args = [qp, kp, vp]

    if has_mask:
        mblk = (1 if mask_b_is1 else block_b,
                1 if mask_q_is1 else block_q,
                1 if mask_k_is1 else block_k)

        def mask_index(b, qi, ki, _b=not mask_b_is1, _q=not mask_q_is1,
                       _k=not mask_k_is1):
            return (b if _b else 0, qi if _q else 0, ki if _k else 0)

        in_specs.append(pl.BlockSpec(mblk, mask_index))
        args.append(mask)

    # TODO(synk): single-head H=16 keeps the PV matmul N-dim and the output store
    # lane-sparse; fusing >=8 heads per call (head axis >= 128 lanes) is the real
    # structural fix but is outside this module's single-head interface.
    return pl.pallas_call(
        _make_attn_kernel(has_mask),
        out_shape=jax.ShapeDtypeStruct((B, S, H), x.dtype),
        grid_spec=pltpu.PrefetchScalarGridSpec(
            num_scalar_prefetch=0,
            grid=grid,
            in_specs=in_specs,
            out_specs=pl.BlockSpec((block_b, block_q, H),
                                   lambda b, qi, ki: (b, qi, 0)),
            scratch_shapes=[
                pltpu.VMEM((block_b, block_q, 1), jnp.float32),   # running max m
                pltpu.VMEM((block_b, block_q, 1), jnp.float32),   # running denom l
                pltpu.VMEM((block_b, block_q, H), jnp.float32),   # output accumulator
            ]),
        compiler_params=pltpu.CompilerParams(
            dimension_semantics=("parallel", "parallel", "arbitrary"),
            vmem_limit_bytes=vmem_limit),
    )(*args)


# ----------------------------- reference & test ------------------------------

def _reference(x, wq, wk, wv, bq, bk, bv, mask=None):
    q = x @ wq + bq
    k = x @ wk + bk
    v = x @ wv + bv
    att = q @ jnp.swapaxes(k, -2, -1) / (q.shape[-1] ** 0.5)
    if mask is not None:
        att = jnp.where(mask == 0, -jnp.inf, att)
    att = jax.nn.softmax(att, axis=-1)
    return att @ v


if __name__ == "__main__":
    key = jax.random.PRNGKey(0)
    B, S, E, H = 2, 8, 32, 16   # batch, seq, embedd_dim, head_dim

    ks = jax.random.split(key, 8)
    x = jax.random.normal(ks[0], (B, S, E), dtype=jnp.float32)

    # nn.Linear-style init, stored as [E, H] (transpose of PyTorch's [H, E]).
    lim = 1.0 / (E ** 0.5)
    wq = jax.random.uniform(ks[1], (E, H), jnp.float32, -lim, lim)
    wk = jax.random.uniform(ks[2], (E, H), jnp.float32, -lim, lim)
    wv = jax.random.uniform(ks[3], (E, H), jnp.float32, -lim, lim)
    bq = jax.random.uniform(ks[4], (H,), jnp.float32, -lim, lim)
    bk = jax.random.uniform(ks[5], (H,), jnp.float32, -lim, lim)
    bv = jax.random.uniform(ks[6], (H,), jnp.float32, -lim, lim)

    # 1) Unmasked path (no mask tensor is materialized or streamed).
    out = jax.block_until_ready(attention_head(x, wq, wk, wv, bq, bk, bv))
    ref = _reference(x, wq, wk, wv, bq, bk, bv)
    assert out.shape == (B, S, H)
    err = float(jnp.max(jnp.abs(out - ref)))
    assert err < 1e-4, f"unmasked mismatch: {err}"

    # 2) Key-padding mask streamed in its natural broadcast shape [B, 1, S].
    lengths = jnp.array([6, 8])
    pad_mask = (jnp.arange(S)[None, :] < lengths[:, None]).astype(jnp.int32)
    pad_mask = pad_mask[:, None, :]                       # [B, 1, S]
    out_p = jax.block_until_ready(
        attention_head(x, wq, wk, wv, bq, bk, bv, mask=pad_mask))
    ref_p = _reference(x, wq, wk, wv, bq, bk, bv, mask=pad_mask)
    err_p = float(jnp.max(jnp.abs(out_p - ref_p)))
    assert err_p < 1e-4, f"padding-mask mismatch: {err_p}"

    # 3) Dense [B, S, S] mask (no fully-masked rows).
    m_full = (jax.random.uniform(ks[7], (B, S, S)) > 0.3).astype(jnp.int32)
    m_full = m_full.at[:, :, 0].set(1)
    out_m = jax.block_until_ready(
        attention_head(x, wq, wk, wv, bq, bk, bv, mask=m_full))
    ref_m = _reference(x, wq, wk, wv, bq, bk, bv, mask=m_full)
    err_m = float(jnp.max(jnp.abs(out_m - ref_m)))
    assert err_m < 1e-4, f"dense-mask mismatch: {err_m}"

    print("KERNEL_OK")
</pallas_src>

<mosaic_0001>
module attributes {stable_mosaic.version = 11 : i64} {
  func.func @_proj_kernel(%arg0: i32, %arg1: memref<8x32xf32, #tpu.memory_space<vmem>>, %arg2: memref<32x16xf32, #tpu.memory_space<vmem>>, %arg3: memref<32x16xf32, #tpu.memory_space<vmem>>, %arg4: memref<32x16xf32, #tpu.memory_space<vmem>>, %arg5: memref<1x16xf32, #tpu.memory_space<vmem>>, %arg6: memref<1x16xf32, #tpu.memory_space<vmem>>, %arg7: memref<1x16xf32, #tpu.memory_space<vmem>>, %arg8: memref<8x16xf32, #tpu.memory_space<vmem>>, %arg9: memref<8x16xf32, #tpu.memory_space<vmem>>, %arg10: memref<8x16xf32, #tpu.memory_space<vmem>>) attributes {dimension_semantics = [#tpu.dimension_semantics<parallel>], iteration_bounds = array<i64: 2>, scalar_prefetch = 0 : i64, scratch_operands = 0 : i64, tpu.core_type = #tpu.core_type<tc>, window_params = [{transform_indices = @transform_0, window_bounds = array<i64: 8, 32>}, {pipeline_mode = #tpu.pipeline_mode<synchronous>, transform_indices = @transform_1, window_bounds = array<i64: 32, 16>}, {pipeline_mode = #tpu.pipeline_mode<synchronous>, transform_indices = @transform_2, window_bounds = array<i64: 32, 16>}, {pipeline_mode = #tpu.pipeline_mode<synchronous>, transform_indices = @transform_3, window_bounds = array<i64: 32, 16>}, {pipeline_mode = #tpu.pipeline_mode<synchronous>, transform_indices = @transform_4, window_bounds = array<i64: 1, 16>}, {pipeline_mode = #tpu.pipeline_mode<synchronous>, transform_indices = @transform_5, window_bounds = array<i64: 1, 16>}, {pipeline_mode = #tpu.pipeline_mode<synchronous>, transform_indices = @transform_6, window_bounds = array<i64: 1, 16>}, {transform_indices = @transform_7, window_bounds = array<i64: 8, 16>}, {transform_indices = @transform_8, window_bounds = array<i64: 8, 16>}, {transform_indices = @transform_9, window_bounds = array<i64: 8, 16>}]} {
    %c0 = arith.constant 0 : index
    %c0_0 = arith.constant 0 : index
    %0 = vector.load %arg1[%c0, %c0_0] : memref<8x32xf32, #tpu.memory_space<vmem>>, vector<8x32xf32>
    %c0_1 = arith.constant 0 : index
    %c0_2 = arith.constant 0 : index
    %1 = vector.load %arg2[%c0_1, %c0_2] : memref<32x16xf32, #tpu.memory_space<vmem>>, vector<32x16xf32>
    %cst = arith.constant dense<0.000000e+00> : vector<8x16xf32>
    %2 = tpu.matmul %0, %1, %cst {dimension_numbers = #tpu.dot_dimension_numbers<[1], [0], [0], [1], [0, 0, 1, 1], [], []>} : vector<8x32xf32>, vector<32x16xf32>, vector<8x16xf32> -> vector<8x16xf32>
    %c0_3 = arith.constant 0 : index
    %c0_4 = arith.constant 0 : index
    %3 = vector.load %arg5[%c0_3, %c0_4] : memref<1x16xf32, #tpu.memory_space<vmem>>, vector<1x16xf32>
    %4 = vector.broadcast %3 : vector<1x16xf32> to vector<8x16xf32>
    %5 = arith.addf %2, %4 : vector<8x16xf32>
    %cst_5 = arith.constant 2.500000e-01 : f32
    %6 = vector.broadcast %cst_5 : f32 to vector<8x16xf32>
    %7 = arith.mulf %5, %6 : vector<8x16xf32>
    %c0_6 = arith.constant 0 : index
    %c0_7 = arith.constant 0 : index
    %8 = vector.load %arg8[%c0_6, %c0_7] : memref<8x16xf32, #tpu.memory_space<vmem>>, vector<8x16xf32>
    tpu.vector_store %arg8[%c0_6, %c0_7], %7 {strides = array<i32>} : memref<8x16xf32, #tpu.memory_space<vmem>>, vector<8x16xf32>,
    %c0_8 = arith.constant 0 : index
    %c0_9 = arith.constant 0 : index
    %9 = vector.load %arg3[%c0_8, %c0_9] : memref<32x16xf32, #tpu.memory_space<vmem>>, vector<32x16xf32>
    %cst_10 = arith.constant dense<0.000000e+00> : vector<8x16xf32>
    %10 = tpu.matmul %0, %9, %cst_10 {dimension_numbers = #tpu.dot_dimension_numbers<[1], [0], [0], [1], [0, 0, 1, 1], [], []>} : vector<8x32xf32>, vector<32x16xf32>, vector<8x16xf32> -> vector<8x16xf32>
    %c0_11 = arith.constant 0 : index
    %c0_12 = arith.constant 0 : index
    %11 = vector.load %arg6[%c0_11, %c0_12] : memref<1x16xf32, #tpu.memory_space<vmem>>, vector<1x16xf32>
    %12 = vector.broadcast %11 : vector<1x16xf32> to vector<8x16xf32>
    %13 = arith.addf %10, %12 : vector<8x16xf32>
    %c0_13 = arith.constant 0 : index
    %c0_14 = arith.constant 0 : index
    %14 = vector.load %arg9[%c0_13, %c0_14] : memref<8x16xf32, #tpu.memory_space<vmem>>, vector<8x16xf32>
    tpu.vector_store %arg9[%c0_13, %c0_14], %13 {strides = array<i32>} : memref<8x16xf32, #tpu.memory_space<vmem>>, vector<8x16xf32>,
    %c0_15 = arith.constant 0 : index
    %c0_16 = arith.constant 0 : index
    %15 = vector.load %arg4[%c0_15, %c0_16] : memref<32x16xf32, #tpu.memory_space<vmem>>, vector<32x16xf32>
    %cst_17 = arith.constant dense<0.000000e+00> : vector<8x16xf32>
    %16 = tpu.matmul %0, %15, %cst_17 {dimension_numbers = #tpu.dot_dimension_numbers<[1], [0], [0], [1], [0, 0, 1, 1], [], []>} : vector<8x32xf32>, vector<32x16xf32>, vector<8x16xf32> -> vector<8x16xf32>
    %c0_18 = arith.constant 0 : index
    %c0_19 = arith.constant 0 : index
    %17 = vector.load %arg7[%c0_18, %c0_19] : memref<1x16xf32, #tpu.memory_space<vmem>>, vector<1x16xf32>
    %18 = vector.broadcast %17 : vector<1x16xf32> to vector<8x16xf32>
    %19 = arith.addf %16, %18 : vector<8x16xf32>
    %c0_20 = arith.constant 0 : index
    %c0_21 = arith.constant 0 : index
    %20 = vector.load %arg10[%c0_20, %c0_21] : memref<8x16xf32, #tpu.memory_space<vmem>>, vector<8x16xf32>
    tpu.vector_store %arg10[%c0_20, %c0_21], %19 {strides = array<i32>} : memref<8x16xf32, #tpu.memory_space<vmem>>, vector<8x16xf32>,
    return
  }
  func.func @transform_0(%arg0: i32) -> (i32, i32) {
    %c0_i32 = arith.constant 0 : i32
    %c0_i32_0 = arith.constant 0 : i32
    return %arg0, %c0_i32 : i32, i32
  }
  func.func @transform_1(%arg0: i32) -> (i32, i32) {
    %c0_i32 = arith.constant 0 : i32
    %c0_i32_0 = arith.constant 0 : i32
    %c0_i32_1 = arith.constant 0 : i32
    return %c0_i32, %c0_i32_0 : i32, i32
  }
  func.func @transform_2(%arg0: i32) -> (i32, i32) {
    %c0_i32 = arith.constant 0 : i32
    %c0_i32_0 = arith.constant 0 : i32
    %c0_i32_1 = arith.constant 0 : i32
    return %c0_i32, %c0_i32_0 : i32, i32
  }
  func.func @transform_3(%arg0: i32) -> (i32, i32) {
    %c0_i32 = arith.constant 0 : i32
    %c0_i32_0 = arith.constant 0 : i32
    %c0_i32_1 = arith.constant 0 : i32
    return %c0_i32, %c0_i32_0 : i32, i32
  }
  func.func @transform_4(%arg0: i32) -> (i32, i32) {
    %c0_i32 = arith.constant 0 : i32
    %c0_i32_0 = arith.constant 0 : i32
    %c0_i32_1 = arith.constant 0 : i32
    return %c0_i32, %c0_i32_0 : i32, i32
  }
  func.func @transform_5(%arg0: i32) -> (i32, i32) {
    %c0_i32 = arith.constant 0 : i32
    %c0_i32_0 = arith.constant 0 : i32
    %c0_i32_1 = arith.constant 0 : i32
    return %c0_i32, %c0_i32_0 : i32, i32
  }
  func.func @transform_6(%arg0: i32) -> (i32, i32) {
    %c0_i32 = arith.constant 0 : i32
    %c0_i32_0 = arith.constant 0 : i32
    %c0_i32_1 = arith.constant 0 : i32
    return %c0_i32, %c0_i32_0 : i32, i32
  }
  func.func @transform_7(%arg0: i32) -> (i32, i32) {
    %c0_i32 = arith.constant 0 : i32
    %c0_i32_0 = arith.constant 0 : i32
    return %arg0, %c0_i32 : i32, i32
  }
  func.func @transform_8(%arg0: i32) -> (i32, i32) {
    %c0_i32 = arith.constant 0 : i32
    %c0_i32_0 = arith.constant 0 : i32
    return %arg0, %c0_i32 : i32, i32
  }
  func.func @transform_9(%arg0: i32) -> (i32, i32) {
    %c0_i32 = arith.constant 0 : i32
    %c0_i32_0 = arith.constant 0 : i32
    return %arg0, %c0_i32 : i32, i32
  }
}

</mosaic_0001>

<bundles_post_ra>
// kernel: tpu_custom_call.1
= control target key start
LH: loop header
LB: loop body
LE: loop exit
PB: predicated region body
PF: predicated region fallthrough
CT: control target
= control target key end

     0   :  { %s1078_s0 = inlined_call_operand.vmem [shape: f32[16,32], index: 0, kind: input, shape index: {}]   ;;  %s1079_s1 = inlined_call_operand.vmem [shape: f32[32,16], index: 1, kind: input, shape index: {}]   ;;  %s1080_s2 = inlined_call_operand.vmem [shape: f32[32,16], index: 2, kind: input, shape index: {}]   ;;  %s1081_s3 = inlined_call_operand.vmem [shape: f32[32,16], index: 3, kind: input, shape index: {}]   ;;  %s1082_s4 = inlined_call_operand.vmem [shape: f32[1,16], index: 4, kind: input, shape index: {}]   ;;  %s1083_s5 = inlined_call_operand.vmem [shape: f32[1,16], index: 5, kind: input, shape index: {}]   ;;  %s1084_s6 = inlined_call_operand.vmem [shape: f32[1,16], index: 6, kind: input, shape index: {}]   ;;  %s1085_s7 = inlined_call_operand.hbm [shape: f32[16,16], index: 7, kind: output, shape index: {0}]   ;;  %s1086_s8 = inlined_call_operand.hbm [shape: f32[16,16], index: 8, kind: output, shape index: {1}]   ;;  %s1087_s9 = inlined_call_operand.hbm [shape: f32[16,16], index: 9, kind: output, shape index: {2}]  }
   0x1   :  { %1092 = sst [smem:[#allocation10_spill]] %s1078_s0 }
   0x2   :  { %1093 = sst [smem:[#allocation11_spill]] %s1079_s1 }
   0x3   :  { %1094 = sst [smem:[#allocation12_spill]] %s1080_s2 }
   0x4   :  { %1095 = sst [smem:[#allocation13_spill]] %s1081_s3 }
   0x5   :  { %15 = vsyncpa [#allocation3], 0 }
   0x6   :  { %17 = vsyncpa [#allocation3 + $0x1], 0 }
   0x7   :  { %18 = vsyncpa [#allocation5], 0 }
   0x8   :  { %20 = vsyncpa [#allocation5 + $0x1], 0  ;;  %s861_s30 = smov 0   ;;  %s863_s10 = smov 0  }
   0x9   :  { %s865_s11 = smov 0   ;;  %s867_s12 = smov 0  }
   0xa LB: > { %s882_s13 = sadd.s32 4294967295, %s809_s12   ;;  %s1088_s14 = sadd.s32 4294967294, %s809_s12   ;;  %s809_s12 = sphi %s867_s12, %s1111_s12   ;;  %s805_s11 = sphi %s865_s11, %s1110_s11   ;;  %s801_s10 = sphi %s863_s10, %s1109_s10   ;;  %s797_s30 = sphi %s861_s30, %s1108_s30  }
   0xb   : > { %s886_s15 = sadd.s32 1, %s809_s12   ;;  %s185_s16 = sadd.s32 1, %s805_s11 }
   0xc   : > { %s182_s17 = ssub.s32 %s809_s12, %s886_s15  ;;  %p195_p0 = scmp.ne.s32.totalorder %s805_s11, %s801_s10 }
   0xd   : > { %p183_p1 = scmp.eq.s32.totalorder %s182_s17, 0  ;;  %p196_p2 = scmp.eq.s32.totalorder %s882_s13, 1 }
   0xe   : > { %p201_p3 = scmp.ne.s32.totalorder %s801_s10, %s797_s30  ;;  %p202_p4 = scmp.eq.s32.totalorder %s1088_s14, 1 }
   0xf   : > { %s899_s18 = scalar_select %p183_p1, %s805_s11, %s185_s16  }
  0x10   : > { %p901_p5 = por %p196_p2, %p195_p0  ;;  %p905_p6 = por %p202_p4, %p201_p3 }
  0x11   : > { %p619_p7 = scmp.ge.s32.totalorder %s809_s12, 1  ;;  %p297_p8 = scmp.lt.s32.totalorder %s809_s12, 3 }
  0x13   : > { %p298_p9 = pnand %p619_p7, %p297_p8 }
  0x15   : > { %301 = sbr.rel (%p298_p9) target bundleno = 199 (0xc7), region = 48 }
  0x1a   : > { %s1098_s3 = sld [smem:[#allocation13_spill]]  ;;  %p342_p10 = scmp.lt.s32.totalorder %s882_s13, 1  ;;  %vm355_vm0 = vcmask 261120   ;;  %v684_v13 = vld [vmem:[%s1082_s4] ss:$0 sm:$0xff]  ;;  %vm380_vm1 = vcmask 130048  }
  0x1b   : > { %s1099_s1 = sld [smem:[#allocation11_spill]]  ;;  %s630_s16 = sshll.u32 %s882_s13, 3  ;;  %v685_v14 = vld [vmem:[%s1083_s5] ss:$0 sm:$0xff] }
  0x1c   : > { %s1100_s2 = sld [smem:[#allocation12_spill]]  ;;  %v686_v20 = vld [vmem:[%s1084_s6] ss:$0 sm:$0xff] }
  0x1d   : > { %s343_s24 = scalar_select %p342_p10, %s882_s13, 1 }
  0x1e   : > { %s1101_s0 = sld [smem:[#allocation10_spill]] }
  0x1f   : > { %s623_s17 = sshll.u32 %s343_s24, 3  ;;  %s1089_s24 = sand.u32 1, %s801_s10  }
  0x20   : > { %v414_v0 = vld [vmem:[%s1098_s3 + $0x18] sm:$0xff]  ;;  %v413_v1 = vld [vmem:[%s1098_s3 + $0x10] sm:$0xff]  ;;  %v412_v5 = vld [vmem:[%s1098_s3 + $0x8] sm:$0xff]  ;;  %s955_s29 = sshll.u32 %s1089_s24, 3 }
  0x21   : > { %v350_v2 = vld [vmem:[%s1099_s1 + $0x18] sm:$0xff]  ;;  %431 = vmatpush.msra.mxu2 %v414_v0  ;;  %v349_v4 = vld [vmem:[%s1099_s1 + $0x10] sm:$0xff]  ;;  %v348_v7 = vld [vmem:[%s1099_s1 + $0x8] sm:$0xff]  ;;  %s334_s27 = scalar_lea.vmem [#allocation4], %s955_s29  ;;  %s327_s25 = scalar_lea.vmem [#allocation2], %s955_s29 }
  0x22   : > { %371 = vmatpush.msra.mxu0 %v350_v2  ;;  %v385_v3 = vld [vmem:[%s1100_s2 + $0x18] sm:$0xff]  ;;  %v384_v6 = vld [vmem:[%s1100_s2 + $0x10] sm:$0xff]  ;;  %v383_v8 = vld [vmem:[%s1100_s2 + $0x8] sm:$0xff]  ;;  %s966_s28 = sshll.u32 %s334_s27, 4  ;;  %s478_s28 = int_to_ptr.vmem [resolvable:$true] %s966_s28 }
  0x23   : > { %402 = vmatpush.msra.mxu1 %v385_v3  ;;  %432 = vmatpush.msra.mxu2 %v413_v1  ;;  %v411_v9 = vld [vmem:[%s1098_s3] sm:$0xff]  ;;  %s983_s3 = sshll.u32 %s327_s25, 4 }
  0x24   : > { %372 = vmatpush.msra.mxu0 %v349_v4  ;;  %v347_v10 = vld [vmem:[%s1099_s1] sm:$0xff]  ;;  %s345_s26 = scalar_lea.vmem %s1101_s0, %s623_s17  ;;  %s445_s17 = sand.u32 1, %s882_s13  }
  0x25   : > { %403 = vmatpush.msra.mxu1 %v384_v6  ;;  %433 = vmatpush.msra.mxu2 %v412_v5  ;;  %v346_v11 = vld [vmem:[%s345_s26] sm:$0xff]  ;;  %s475_s26 = scalar_lea.hbm %s1086_s8, %s630_s16  ;;  %s461_s0 = scalar_lea.hbm %s1085_s7, %s630_s16 }
  0x26   : > { %373 = vmatpush.msra.mxu0 %v348_v7  ;;  %v382_v12 = vld [vmem:[%s1100_s2] sm:$0xff]  ;;  %s489_s2 = scalar_lea.hbm %s1087_s9, %s630_s16  ;;  %s978_s23 = sshll.u32 %s475_s26, 4  ;;  %s480_s23 = int_to_ptr.hbm [resolvable:$true] %s978_s23 }
  0x27   : > { %404 = vmatpush.msra.mxu1 %v383_v8  ;;  %434 = vmatpush.msra.mxu2 %v411_v9  ;;  %1102 = sst [smem:[#allocation9_spill]] %s983_s3  ;;  %s985_s14 = sshll.u32 %s461_s0, 4  ;;  %s466_s14 = int_to_ptr.hbm [resolvable:$true] %s985_s14 }
  0x28   : > { %374 = vmatpush.msra.mxu0 %v347_v10  ;;  %626 = vmatmul.msk.f32.vlgmr.msra.gmra.mxu2 %vm355_vm0, %v346_v11  ;;  %s1090_s1 = scalar_lea.vmem [#allocation6], %s955_s29  ;;  %s992_s16 = sshll.u32 %s489_s2, 4  ;;  %s494_s16 = int_to_ptr.hbm [resolvable:$true] %s992_s16 }
  0x29   : > { %624 = vmatmul.msk.f32.vlgmr.msra.gmra.mxu0 %vm355_vm0, %v346_v11  ;;  %405 = vmatpush.msra.mxu1 %v382_v12  ;;  %s990_s24 = sshll.u32 %s1090_s1, 4  ;;  %s1003_s0 = scalar_lea.sflag [#allocation5], %s445_s17  ;;  %s492_s24 = int_to_ptr.vmem [resolvable:$true] %s990_s24 }
  0x2a   : > { %625 = vmatmul.msk.f32.vlgmr.msra.gmra.mxu1 %vm355_vm0, %v346_v11  ;;  %s701_s2 = sshra.s32 %s480_s23, 4  ;;  %s707_s13 = scalar_lea.hbm %s1086_s8, 16  ;;  %s702_s2 = int_to_ptr.hbm [resolvable:$true] %s701_s2 }
  0x2b   : > { %s703_s21 = scalar_lea.hbm %s702_s2, 8  ;;  %p708_p0 = scmp.lt.s32.totalorder %s702_s2, %s1086_s8 }
  0x2c   : > { %p704_p11 = scmp.ne.s32.totalorder %s702_s2, %s703_s21  ;;  %p709_p1 = scmp.lt.s32.totalorder %s707_s13, %s703_s21 }
  0x2e   : > { %p705_p12 = pnand %p704_p11, %p901_p5  ;;  %p710_p2 = por %p709_p1, %p708_p0 }
  0x30   : > { %p706_p13 = pneg %p705_p12 }
  0x32   : > { %p711_p3 = pnand %p710_p2, %p706_p13 }
  0xa6   : > { %v376_v15 = vpop.f32.mrf.mxu0 }
  0xa7   : > { %v377_v16 = vadd.f32 %v684_v13, %v376_v15  ;;  %v407_v17 = vpop.f32.mrf.mxu1 }
  0xa8   : > { %v408_v19 = vadd.f32 %v685_v14, %v407_v17 }
  0xa9   : > { %v379_v18 = vmul.f32 0.25, %v377_v16 }
  0xaa   : > { %410 = vst.msk [vmem:[%s334_s27] sm:$0xff] %vm380_vm1, %v408_v19 }
  0xab   : > { %v436_v21 = vpop.f32.mrf.mxu2 }
  0xac   : > { %714 = shalt.err (!%p711_p3)
}
  0xad   : > { %636 = dma.vmem_to_hbm [thread:$0]  (%p901_p5), %s478_s28, 128, %s480_s23, %s1003_s0   ;;  %381 = vst.msk [vmem:[%s327_s25] sm:$0xff] %vm380_vm1, %v379_v18  ;;  %v437_v22 = vadd.f32 %v686_v20, %v436_v21 }
  0xae   : > { %s1103_s3 = sand.u32 1, %s801_s10   ;;  %s729_s27 = sshra.s32 %s466_s14, 4  ;;  %s730_s27 = int_to_ptr.hbm [resolvable:$true] %s729_s27 }
  0xaf   : > { %s441_s17 = scalar_lea.sflag [#allocation3], %s1103_s3  ;;  %s731_s1 = scalar_lea.hbm %s730_s27, 8 }
  0xb0   : > { %p732_p4 = scmp.ne.s32.totalorder %s730_s27, %s731_s1  ;;  %s735_s22 = scalar_lea.hbm %s1085_s7, 16 }
  0xb1   : > { %p736_p9 = scmp.lt.s32.totalorder %s730_s27, %s1085_s7  ;;  %p737_p10 = scmp.lt.s32.totalorder %s735_s22, %s731_s1 }
  0xb2   : > { %p733_p7 = pnand %p732_p4, %p901_p5 }
  0xb3   : > { %p738_p11 = por %p737_p10, %p736_p9 }
  0xb4   : > { %p734_p8 = pneg %p733_p7 }
  0xb6   : > { %p739_p12 = pnand %p738_p11, %p734_p8 }
  0xb8   : > { %742 = shalt.err (!%p739_p12)
}
  0xb9   : > { %s1104_s23 = sld [smem:[#allocation9_spill]]  ;;  %s1106_s13 = scalar_lea.vmem [#allocation6], %s955_s29 }
  0xba   : > { %439 = vst.msk [vmem:[%s1106_s13] sm:$0xff] %vm380_vm1, %v437_v22  ;;  %s757_s3 = sshra.s32 %s494_s16, 4  ;;  %s763_s21 = scalar_lea.hbm %s1087_s9, 16  ;;  %s758_s3 = int_to_ptr.hbm [resolvable:$true] %s757_s3 }
  0xbb   : > { %s759_s27 = scalar_lea.hbm %s758_s3, 8  ;;  %p764_p2 = scmp.lt.s32.totalorder %s758_s3, %s1087_s9 }
  0xbc   : > { %p760_p13 = scmp.ne.s32.totalorder %s758_s3, %s759_s27  ;;  %p765_p3 = scmp.lt.s32.totalorder %s763_s21, %s759_s27 }
  0xbe   : > { %p761_p0 = pnand %p760_p13, %p901_p5  ;;  %p766_p4 = por %p765_p3, %p764_p2 }
  0xbf   : > { %s1105_s25 = int_to_ptr.vmem [resolvable:$true] %s1104_s23 }
  0xc0   : > { %635 = dma.vmem_to_hbm [thread:$0]  (%p901_p5), %s1105_s25, 128, %s466_s14, %s441_s17  }
  0xc1   : > { %p762_p1 = pneg %p761_p0 }
  0xc3   : > { %p767_p7 = pnand %p766_p4, %p762_p1 }
  0xc5   : > { %770 = shalt.err (!%p767_p7)
}
  0xc6   : > { %637 = dma.vmem_to_hbm [thread:$0]  (%p901_p5), %s492_s24, 128, %s494_s16, %s1003_s0  }
  0xc7 PF: > { %p651_p8 = scmp.ge.s32.totalorder %s809_s12, 2  ;;  %s505_s29 = sand.u32 1, %s797_s30  }
  0xc8   : > { %s506_s14 = scalar_lea.sflag [#allocation3], %s505_s29 }
  0xc9   : > { %p642_p9 = pnand %p651_p8, %p905_p6 }
  0xcb   : > { %p643_p10 = pneg %p642_p9 }
  0xcd   : > { %788 = dma.done.wait (%p643_p10), %s506_s14, 128  }
  0xce   : > { %790 = vsyncadd (%p643_p10), %s506_s14, 4294967168  ;;  %s1107_s19 = sadd.s32 4294967294, %s809_s12  }
  0xcf   : > { %s515_s17 = sand.u32 1, %s1107_s19  }
  0xd0   : > { %s516_s28 = scalar_lea.sflag [#allocation5], %s515_s17 }
  0xd1   : > { %792 = dma.done.wait (%p643_p10), %s516_s28, 256  }
  0xd2   : > { %794 = vsyncadd (%p643_p10), %s516_s28, 4294967040  ;;  %p23_p5 = scmp.ge.s32.totalorder %s886_s15, 4   ;;  %s1108_s30 = smov %s801_s10 }
  0xd3   : > { %s1109_s10 = smov %s805_s11  ;;  %s1110_s11 = smov %s899_s18 }
  0xd4   : > { %s1111_s12 = smov %s886_s15  ;;  %25 = sbr.rel (!%p23_p5) target bundleno = 10 (0xa), region = 115 }
  0xd9   :  { %532 = vsyncpa [#allocation3], 1 }
  0xda   :  { %534 = vsyncpa [#allocation3 + $0x1], 1 }
  0xdb   :  { %535 = vsyncpa [#allocation5], 1 }
  0xdc   :  { %537 = vsyncpa [#allocation5 + $0x1], 1 }

</bundles_post_ra>
